<compile_context>
chip_gen: v5e
topology: v5e:2x2
jax: 0.10.0
libtpu: 0.0.40
codegen_flags: <defaults>
</compile_context>

<pallas_src>
import functools

import jax
import jax.numpy as jnp
from jax import lax
from jax.experimental import pallas as pl
from jax.experimental.pallas import tpu as pltpu

NUM_BOND_TYPE = 6
NUM_BOND_DIRECTION = 3
NUM_ATOM_TYPE = 120
NUM_CHIRALITY_TAG = 3

LANE = 128
SUBLANE = 8
EDGE_TABLE_ROWS = 16          # rows [0:6] = bond type, rows [8:11] = bond direction


def _round_up(x, m):
    return ((x + m - 1) // m) * m


# ---------------------------------------------------------------------------
# Pallas kernel: one grid step == one GIN layer (aggregation + MLP + BN + ReLU).
# out_ref (constant index_map) is the VMEM-resident carry across layers.
# ---------------------------------------------------------------------------
def gnn_kernel(h0_ref, adj_ref, cnt_ref, mask_ref,
               etab_ref, w1_ref, b1_ref, w2_ref, b2_ref, gamma_ref, beta_ref,
               out_ref, *, n_nodes):
    layer = pl.program_id(0)
    num_layers = pl.num_programs(0)

    # Layer 0: seed the carried node-feature buffer with the input embedding.
    @pl.when(layer == 0)
    def _():
        out_ref[...] = h0_ref[...]

    h = out_ref[...]                                               # (Np, Dp) f32

    # ---- GIN message + aggr='add' as dense MXU matmuls ---------------------
    #   agg[n] = sum_{e: tgt(e)=n} ( h[src(e)] + edge_emb(e) )
    #          = (A @ h)[n] + (C @ T_layer)[n]
    agg = jnp.dot(adj_ref[...], h, preferred_element_type=jnp.float32)
    agg = agg + jnp.dot(cnt_ref[...], etab_ref[...],
                        preferred_element_type=jnp.float32)

    # ---- GIN update MLP: Linear(D,2D) -> ReLU -> Linear(2D,D) (bf16 MXU) ---
    h1 = jnp.dot(agg.astype(jnp.bfloat16), w1_ref[...],
                 preferred_element_type=jnp.float32) + b1_ref[...]
    h1 = jnp.maximum(h1, 0.0)
    h2 = jnp.dot(h1.astype(jnp.bfloat16), w2_ref[...],
                 preferred_element_type=jnp.float32) + b2_ref[...]

    # ---- BatchNorm1d (training-mode batch stats, eps=1e-5), masked to real rows
    mask = mask_ref[...]                                           # (Np, 1) f32
    inv_n = jnp.float32(1.0 / n_nodes)
    mean = jnp.sum(h2 * mask, axis=0, keepdims=True) * inv_n
    diff = (h2 - mean) * mask
    var = jnp.sum(diff * diff, axis=0, keepdims=True) * inv_n
    h_bn = (h2 - mean) * lax.rsqrt(var + 1e-5) * gamma_ref[...] + beta_ref[...]

    is_last = layer == num_layers - 1

    # dropout(p=0.0) is identity; ReLU on all but the last layer (pl.when-gated).
    @pl.when(jnp.logical_not(is_last))
    def _():
        out_ref[...] = jnp.maximum(h_bn, 0.0)

    @pl.when(is_last)
    def _():
        out_ref[...] = h_bn                                        # JK == 'last'


# ---------------------------------------------------------------------------
# Parameter init (matches the PyTorch module's structure)
# ---------------------------------------------------------------------------
def xavier_uniform(key, shape):
    fan_in, fan_out = shape[0], shape[1]
    limit = (6.0 / (fan_in + fan_out)) ** 0.5
    return jax.random.uniform(key, shape, jnp.float32, -limit, limit)


def init_gnn_params(key, num_layer, emb_dim):
    keys = jax.random.split(key, 2 + 4 * num_layer)
    params = {
        "x_emb1": xavier_uniform(keys[0], (NUM_ATOM_TYPE, emb_dim)),
        "x_emb2": xavier_uniform(keys[1], (NUM_CHIRALITY_TAG, emb_dim)),
        "layers": [],
    }
    for layer in range(num_layer):
        k = keys[2 + 4 * layer: 2 + 4 * (layer + 1)]
        params["layers"].append({
            "edge_emb1": xavier_uniform(k[0], (NUM_BOND_TYPE, emb_dim)),
            "edge_emb2": xavier_uniform(k[1], (NUM_BOND_DIRECTION, emb_dim)),
            "w1": xavier_uniform(k[2], (emb_dim, 2 * emb_dim)),
            "b1": jnp.zeros((1, 2 * emb_dim), jnp.float32),
            "w2": xavier_uniform(k[3], (2 * emb_dim, emb_dim)),
            "b2": jnp.zeros((1, emb_dim), jnp.float32),
            "gamma": jnp.ones((1, emb_dim), jnp.float32),
            "beta": jnp.zeros((1, emb_dim), jnp.float32),
        })
    return params


# ---------------------------------------------------------------------------
# Forward wrapper: embeddings, self loops, graph operators, single pallas_call.
# ---------------------------------------------------------------------------
def gnn_forward(params, x, edge_index, edge_attr, num_layer, emb_dim):
    """x: [N,2] int32, edge_index: [2,E] int32, edge_attr: [E,2] int32."""
    n = x.shape[0]

    # node input embedding
    h0 = jnp.take(params["x_emb1"], x[:, 0], axis=0) + \
         jnp.take(params["x_emb2"], x[:, 1], axis=0)                        # [N, D]

    # add self loops (bond type 4, direction 0), same for every layer
    self_loops = jnp.stack([jnp.arange(n, dtype=jnp.int32)] * 2, axis=0)
    ei = jnp.concatenate([edge_index.astype(jnp.int32), self_loops], axis=1)   # [2, E+N]
    self_loop_attr = jnp.concatenate(
        [jnp.full((n, 1), 4, jnp.int32), jnp.zeros((n, 1), jnp.int32)], axis=1)
    ea = jnp.concatenate([edge_attr.astype(jnp.int32), self_loop_attr], axis=0)  # [E+N, 2]

    # PyG 1.0.x (pretrain-gnns) convention: x_j = h[edge_index[1]],
    # aggregation target = edge_index[0].
    tgt = ei[0]
    src = ei[1]

    d = emb_dim
    hdim = 2 * emb_dim
    d_pad = _round_up(d, LANE)
    h_hid_pad = _round_up(hdim, LANE)
    n_pad = _round_up(n, SUBLANE)

    # ---- layer-independent dense graph operators (built once, VMEM-resident) ----
    adj = jnp.zeros((n_pad, n_pad), jnp.float32).at[tgt, src].add(1.0)
    cnt = jnp.zeros((n_pad, EDGE_TABLE_ROWS), jnp.float32)
    cnt = cnt.at[tgt, ea[:, 0]].add(1.0)          # bond-type incidence counts
    cnt = cnt.at[tgt, 8 + ea[:, 1]].add(1.0)      # bond-direction incidence counts

    h0_p = jnp.zeros((n_pad, d_pad), jnp.float32).at[:n, :d].set(h0)
    mask = (jnp.arange(n_pad) < n).astype(jnp.float32).reshape(n_pad, 1)

    # ---- stacked per-layer parameters (MLP weights in bf16, f32 accumulate) ----
    etab_l, w1_l, b1_l, w2_l, b2_l, g_l, bt_l = [], [], [], [], [], [], []
    for lp in params["layers"]:
        et = jnp.zeros((EDGE_TABLE_ROWS, d_pad), jnp.float32)
        et = et.at[:NUM_BOND_TYPE, :d].set(lp["edge_emb1"])
        et = et.at[8:8 + NUM_BOND_DIRECTION, :d].set(lp["edge_emb2"])
        etab_l.append(et)
        w1_l.append(jnp.zeros((d_pad, h_hid_pad), jnp.float32)
                    .at[:d, :hdim].set(lp["w1"]).astype(jnp.bfloat16))
        b1_l.append(jnp.zeros((1, h_hid_pad), jnp.float32).at[:, :hdim].set(lp["b1"]))
        w2_l.append(jnp.zeros((h_hid_pad, d_pad), jnp.float32)
                    .at[:hdim, :d].set(lp["w2"]).astype(jnp.bfloat16))
        b2_l.append(jnp.zeros((1, d_pad), jnp.float32).at[:, :d].set(lp["b2"]))
        g_l.append(jnp.zeros((1, d_pad), jnp.float32).at[:, :d].set(lp["gamma"]))
        bt_l.append(jnp.zeros((1, d_pad), jnp.float32).at[:, :d].set(lp["beta"]))
    etab_all = jnp.stack(etab_l)        # [L, 16, Dp]  f32
    w1_all = jnp.stack(w1_l)            # [L, Dp, Hp]  bf16
    b1_all = jnp.stack(b1_l)            # [L, 1, Hp]   f32
    w2_all = jnp.stack(w2_l)            # [L, Hp, Dp]  bf16
    b2_all = jnp.stack(b2_l)            # [L, 1, Dp]   f32
    gamma_all = jnp.stack(g_l)          # [L, 1, Dp]   f32
    beta_all = jnp.stack(bt_l)          # [L, 1, Dp]   f32

    kernel = functools.partial(gnn_kernel, n_nodes=n)

    # VMEM budget from the actual buffer inventory (x2 for pipeline double-buffers).
    def _nbytes(a):
        return int(a.size) * a.dtype.itemsize
    const_bytes = sum(_nbytes(a) for a in (h0_p, adj, cnt, mask)) + n_pad * d_pad * 4
    layer_bytes = sum(_nbytes(a) for a in (etab_all, w1_all, b1_all, w2_all,
                                           b2_all, gamma_all, beta_all)) // num_layer
    vmem_limit = int(min(max(2 * (const_bytes + layer_bytes) + (2 << 20), 8 << 20),
                         48 << 20))

    flops = num_layer * (2 * n_pad * n_pad * d_pad
                         + 2 * n_pad * EDGE_TABLE_ROWS * d_pad
                         + 2 * n_pad * d_pad * h_hid_pad
                         + 2 * n_pad * h_hid_pad * d_pad)
    bytes_accessed = const_bytes + num_layer * layer_bytes

    out = pl.pallas_call(
        kernel,
        out_shape=jax.ShapeDtypeStruct((n_pad, d_pad), jnp.float32),
        grid_spec=pltpu.PrefetchScalarGridSpec(
            num_scalar_prefetch=0,
            grid=(num_layer,),
            in_specs=[
                pl.BlockSpec((n_pad, d_pad), lambda l: (0, 0)),                   # h0
                pl.BlockSpec((n_pad, n_pad), lambda l: (0, 0)),                   # adjacency
                pl.BlockSpec((n_pad, EDGE_TABLE_ROWS), lambda l: (0, 0)),         # bond counts
                pl.BlockSpec((n_pad, 1), lambda l: (0, 0)),                       # BN row mask
                pl.BlockSpec((None, EDGE_TABLE_ROWS, d_pad), lambda l: (l, 0, 0)),   # bond tables
                pl.BlockSpec((None, d_pad, h_hid_pad), lambda l: (l, 0, 0)),      # w1 (bf16)
                pl.BlockSpec((None, 1, h_hid_pad), lambda l: (l, 0, 0)),          # b1
                pl.BlockSpec((None, h_hid_pad, d_pad), lambda l: (l, 0, 0)),      # w2 (bf16)
                pl.BlockSpec((None, 1, d_pad), lambda l: (l, 0, 0)),              # b2
                pl.BlockSpec((None, 1, d_pad), lambda l: (l, 0, 0)),              # gamma
                pl.BlockSpec((None, 1, d_pad), lambda l: (l, 0, 0)),              # beta
            ],
            out_specs=pl.BlockSpec((n_pad, d_pad), lambda l: (0, 0)),             # carried h
        ),
        compiler_params=pltpu.CompilerParams(
            dimension_semantics=("arbitrary",),        # layers are sequential
            vmem_limit_bytes=vmem_limit,
        ),
        cost_estimate=pl.CostEstimate(
            flops=int(flops), transcendentals=int(num_layer * d_pad),
            bytes_accessed=int(bytes_accessed)),
    )(h0_p, adj, cnt, mask, etab_all, w1_all, b1_all, w2_all, b2_all,
      gamma_all, beta_all)

    # JK == 'last'; strip padding
    return out[:n, :d]


# ---------------------------------------------------------------------------
if __name__ == "__main__":
    num_layer = 2
    emb_dim = 32
    num_nodes = 16
    num_edges = 24

    key = jax.random.PRNGKey(0)
    k_params, k_x0, k_x1, k_src, k_dst, k_e0, k_e1 = jax.random.split(key, 7)

    params = init_gnn_params(k_params, num_layer, emb_dim)

    # node features: [N, 2] (atom type, chirality tag)
    x = jnp.stack([
        jax.random.randint(k_x0, (num_nodes,), 0, NUM_ATOM_TYPE, jnp.int32),
        jax.random.randint(k_x1, (num_nodes,), 0, NUM_CHIRALITY_TAG, jnp.int32),
    ], axis=1)

    # edge_index: [2, E], edge_attr: [E, 2] (bond type, bond direction)
    edge_index = jnp.stack([
        jax.random.randint(k_src, (num_edges,), 0, num_nodes, jnp.int32),
        jax.random.randint(k_dst, (num_edges,), 0, num_nodes, jnp.int32),
    ], axis=0)
    edge_attr = jnp.stack([
        jax.random.randint(k_e0, (num_edges,), 0, NUM_BOND_TYPE, jnp.int32),
        jax.random.randint(k_e1, (num_edges,), 0, NUM_BOND_DIRECTION, jnp.int32),
    ], axis=1)

    out = gnn_forward(params, x, edge_index, edge_attr, num_layer, emb_dim)
    out = jax.block_until_ready(out)
    assert out.shape == (num_nodes, emb_dim)
    print("KERNEL_OK")
</pallas_src>

<mosaic_0001>
module attributes {stable_mosaic.version = 11 : i64} {
  func.func @gnn_kernel(%arg0: i32, %arg1: memref<16x128xf32, #tpu.memory_space<vmem>>, %arg2: memref<16x16xf32, #tpu.memory_space<vmem>>, %arg3: memref<16x16xf32, #tpu.memory_space<vmem>>, %arg4: memref<16x1xf32, #tpu.memory_space<vmem>>, %arg5: memref<1x16x128xf32, #tpu.memory_space<vmem>>, %arg6: memref<1x128x128xbf16, #tpu.memory_space<vmem>>, %arg7: memref<1x1x128xf32, #tpu.memory_space<vmem>>, %arg8: memref<1x128x128xbf16, #tpu.memory_space<vmem>>, %arg9: memref<1x1x128xf32, #tpu.memory_space<vmem>>, %arg10: memref<1x1x128xf32, #tpu.memory_space<vmem>>, %arg11: memref<1x1x128xf32, #tpu.memory_space<vmem>>, %arg12: memref<16x128xf32, #tpu.memory_space<vmem>>) attributes {dimension_semantics = [#tpu.dimension_semantics<arbitrary>], iteration_bounds = array<i64: 2>, scalar_prefetch = 0 : i64, scratch_operands = 0 : i64, tpu.core_type = #tpu.core_type<tc>, window_params = [{pipeline_mode = #tpu.pipeline_mode<synchronous>, transform_indices = @transform_0, window_bounds = array<i64: 16, 128>}, {pipeline_mode = #tpu.pipeline_mode<synchronous>, transform_indices = @transform_1, window_bounds = array<i64: 16, 16>}, {pipeline_mode = #tpu.pipeline_mode<synchronous>, transform_indices = @transform_2, window_bounds = array<i64: 16, 16>}, {pipeline_mode = #tpu.pipeline_mode<synchronous>, transform_indices = @transform_3, window_bounds = array<i64: 16, 1>}, {transform_indices = @transform_4, window_bounds = array<i64: 1, 16, 128>}, {transform_indices = @transform_5, window_bounds = array<i64: 1, 128, 128>}, {transform_indices = @transform_6, window_bounds = array<i64: 1, 1, 128>}, {transform_indices = @transform_7, window_bounds = array<i64: 1, 128, 128>}, {transform_indices = @transform_8, window_bounds = array<i64: 1, 1, 128>}, {transform_indices = @transform_9, window_bounds = array<i64: 1, 1, 128>}, {transform_indices = @transform_10, window_bounds = array<i64: 1, 1, 128>}, {pipeline_mode = #tpu.pipeline_mode<synchronous>, transform_indices = @transform_11, window_bounds = array<i64: 16, 128>}]} {
    %c0_i32 = arith.constant 0 : i32
    %0 = arith.cmpi eq, %arg0, %c0_i32 : i32
    %1 = arith.extui %0 : i1 to i32
    %c0_i32_0 = arith.constant 0 : i32
    %2 = arith.cmpi ne, %1, %c0_i32_0 : i32
    scf.if %2 {
      %c0_40 = arith.constant 0 : index
      %c0_41 = arith.constant 0 : index
      %66 = vector.load %arg1[%c0_40, %c0_41] : memref<16x128xf32, #tpu.memory_space<vmem>>, vector<16x128xf32>
      %c0_42 = arith.constant 0 : index
      %c0_43 = arith.constant 0 : index
      %67 = vector.load %arg12[%c0_42, %c0_43] : memref<16x128xf32, #tpu.memory_space<vmem>>, vector<16x128xf32>
      tpu.vector_store %arg12[%c0_42, %c0_43], %66 {strides = array<i32>} : memref<16x128xf32, #tpu.memory_space<vmem>>, vector<16x128xf32>,
    } else {
    }
    %c0 = arith.constant 0 : index
    %c0_1 = arith.constant 0 : index
    %3 = vector.load %arg12[%c0, %c0_1] : memref<16x128xf32, #tpu.memory_space<vmem>>, vector<16x128xf32>
    %c0_2 = arith.constant 0 : index
    %c0_3 = arith.constant 0 : index
    %4 = vector.load %arg2[%c0_2, %c0_3] : memref<16x16xf32, #tpu.memory_space<vmem>>, vector<16x16xf32>
    %cst = arith.constant dense<0.000000e+00> : vector<16x128xf32>
    %5 = tpu.matmul %4, %3, %cst {dimension_numbers = #tpu.dot_dimension_numbers<[1], [0], [0], [1], [0, 0, 1, 1], [], []>} : vector<16x16xf32>, vector<16x128xf32>, vector<16x128xf32> -> vector<16x128xf32>
    %c0_4 = arith.constant 0 : index
    %c0_5 = arith.constant 0 : index
    %6 = vector.load %arg3[%c0_4, %c0_5] : memref<16x16xf32, #tpu.memory_space<vmem>>, vector<16x16xf32>
    %c0_6 = arith.constant 0 : index
    %c0_7 = arith.constant 0 : index
    %c0_8 = arith.constant 0 : index
    %7 = vector.load %arg5[%c0_6, %c0_7, %c0_8] : memref<1x16x128xf32, #tpu.memory_space<vmem>>, vector<1x16x128xf32>
    %8 = vector.shape_cast %7 : vector<1x16x128xf32> to vector<16x128xf32>
    %cst_9 = arith.constant dense<0.000000e+00> : vector<16x128xf32>
    %9 = tpu.matmul %6, %8, %cst_9 {dimension_numbers = #tpu.dot_dimension_numbers<[1], [0], [0], [1], [0, 0, 1, 1], [], []>} : vector<16x16xf32>, vector<16x128xf32>, vector<16x128xf32> -> vector<16x128xf32>
    %10 = arith.addf %5, %9 : vector<16x128xf32>
    %11 = arith.truncf %10 : vector<16x128xf32> to vector<16x128xbf16>
    %c0_10 = arith.constant 0 : index
    %c0_11 = arith.constant 0 : index
    %c0_12 = arith.constant 0 : index
    %12 = vector.load %arg6[%c0_10, %c0_11, %c0_12] : memref<1x128x128xbf16, #tpu.memory_space<vmem>>, vector<1x128x128xbf16>
    %13 = vector.shape_cast %12 : vector<1x128x128xbf16> to vector<128x128xbf16>
    %cst_13 = arith.constant dense<0.000000e+00> : vector<16x128xf32>
    %14 = tpu.matmul %11, %13, %cst_13 {dimension_numbers = #tpu.dot_dimension_numbers<[1], [0], [0], [1], [0, 0, 1, 1], [], []>} : vector<16x128xbf16>, vector<128x128xbf16>, vector<16x128xf32> -> vector<16x128xf32>
    %c0_14 = arith.constant 0 : index
    %c0_15 = arith.constant 0 : index
    %c0_16 = arith.constant 0 : index
    %15 = vector.load %arg7[%c0_14, %c0_15, %c0_16] : memref<1x1x128xf32, #tpu.memory_space<vmem>>, vector<1x1x128xf32>
    %16 = vector.shape_cast %15 : vector<1x1x128xf32> to vector<1x128xf32>
    %17 = vector.broadcast %16 : vector<1x128xf32> to vector<16x128xf32>
    %18 = arith.addf %14, %17 : vector<16x128xf32>
    %cst_17 = arith.constant 0.000000e+00 : f32
    %19 = vector.broadcast %cst_17 : f32 to vector<16x128xf32>
    %20 = arith.maximumf %18, %19 : vector<16x128xf32>
    %21 = arith.truncf %20 : vector<16x128xf32> to vector<16x128xbf16>
    %c0_18 = arith.constant 0 : index
    %c0_19 = arith.constant 0 : index
    %c0_20 = arith.constant 0 : index
    %22 = vector.load %arg8[%c0_18, %c0_19, %c0_20] : memref<1x128x128xbf16, #tpu.memory_space<vmem>>, vector<1x128x128xbf16>
    %23 = vector.shape_cast %22 : vector<1x128x128xbf16> to vector<128x128xbf16>
    %cst_21 = arith.constant dense<0.000000e+00> : vector<16x128xf32>
    %24 = tpu.matmul %21, %23, %cst_21 {dimension_numbers = #tpu.dot_dimension_numbers<[1], [0], [0], [1], [0, 0, 1, 1], [], []>} : vector<16x128xbf16>, vector<128x128xbf16>, vector<16x128xf32> -> vector<16x128xf32>
    %c0_22 = arith.constant 0 : index
    %c0_23 = arith.constant 0 : index
    %c0_24 = arith.constant 0 : index
    %25 = vector.load %arg9[%c0_22, %c0_23, %c0_24] : memref<1x1x128xf32, #tpu.memory_space<vmem>>, vector<1x1x128xf32>
    %26 = vector.shape_cast %25 : vector<1x1x128xf32> to vector<1x128xf32>
    %27 = vector.broadcast %26 : vector<1x128xf32> to vector<16x128xf32>
    %28 = arith.addf %24, %27 : vector<16x128xf32>
    %c0_25 = arith.constant 0 : index
    %c0_26 = arith.constant 0 : index
    %29 = vector.load %arg4[%c0_25, %c0_26] : memref<16x1xf32, #tpu.memory_space<vmem>>, vector<16x1xf32>
    %30 = vector.broadcast %29 : vector<16x1xf32> to vector<16x128xf32>
    %31 = arith.mulf %28, %30 : vector<16x128xf32>
    %cst_27 = arith.constant dense<0.000000e+00> : vector<128xf32>
    %32 = vector.multi_reduction <add>, %31, %cst_27 [0] : vector<16x128xf32> to vector<128xf32>
    %33 = vector.shape_cast %32 : vector<128xf32> to vector<1x128xf32>
    %cst_28 = arith.constant 6.250000e-02 : f32
    %34 = vector.broadcast %cst_28 : f32 to vector<1x128xf32>
    %35 = arith.mulf %33, %34 : vector<1x128xf32>
    %36 = vector.broadcast %35 : vector<1x128xf32> to vector<16x128xf32>
    %37 = arith.subf %28, %36 : vector<16x128xf32>
    %38 = vector.broadcast %29 : vector<16x1xf32> to vector<16x128xf32>
    %39 = arith.mulf %37, %38 : vector<16x128xf32>
    %40 = arith.mulf %39, %39 : vector<16x128xf32>
    %cst_29 = arith.constant dense<0.000000e+00> : vector<128xf32>
    %41 = vector.multi_reduction <add>, %40, %cst_29 [0] : vector<16x128xf32> to vector<128xf32>
    %42 = vector.shape_cast %41 : vector<128xf32> to vector<1x128xf32>
    %cst_30 = arith.constant 6.250000e-02 : f32
    %43 = vector.broadcast %cst_30 : f32 to vector<1x128xf32>
    %44 = arith.mulf %42, %43 : vector<1x128xf32>
    %45 = vector.broadcast %35 : vector<1x128xf32> to vector<16x128xf32>
    %46 = arith.subf %28, %45 : vector<16x128xf32>
    %cst_31 = arith.constant 9.99999974E-6 : f32
    %47 = vector.broadcast %cst_31 : f32 to vector<1x128xf32>
    %48 = arith.addf %44, %47 : vector<1x128xf32>
    %49 = math.rsqrt %48 : vector<1x128xf32>
    %50 = vector.broadcast %49 : vector<1x128xf32> to vector<16x128xf32>
    %51 = arith.mulf %46, %50 : vector<16x128xf32>
    %c0_32 = arith.constant 0 : index
    %c0_33 = arith.constant 0 : index
    %c0_34 = arith.constant 0 : index
    %52 = vector.load %arg10[%c0_32, %c0_33, %c0_34] : memref<1x1x128xf32, #tpu.memory_space<vmem>>, vector<1x1x128xf32>
    %53 = vector.shape_cast %52 : vector<1x1x128xf32> to vector<1x128xf32>
    %54 = vector.broadcast %53 : vector<1x128xf32> to vector<16x128xf32>
    %55 = arith.mulf %51, %54 : vector<16x128xf32>
    %c0_35 = arith.constant 0 : index
    %c0_36 = arith.constant 0 : index
    %c0_37 = arith.constant 0 : index
    %56 = vector.load %arg11[%c0_35, %c0_36, %c0_37] : memref<1x1x128xf32, #tpu.memory_space<vmem>>, vector<1x1x128xf32>
    %57 = vector.shape_cast %56 : vector<1x1x128xf32> to vector<1x128xf32>
    %58 = vector.broadcast %57 : vector<1x128xf32> to vector<16x128xf32>
    %59 = arith.addf %55, %58 : vector<16x128xf32>
    %c1_i32 = arith.constant 1 : i32
    %60 = arith.cmpi eq, %arg0, %c1_i32 : i32
    %true = arith.constant true
    %61 = arith.xori %60, %true : i1
    %62 = arith.extui %61 : i1 to i32
    %c0_i32_38 = arith.constant 0 : i32
    %63 = arith.cmpi ne, %62, %c0_i32_38 : i32
    scf.if %63 {
      %cst_40 = arith.constant 0.000000e+00 : f32
      %66 = vector.broadcast %cst_40 : f32 to vector<16x128xf32>
      %67 = arith.maximumf %59, %66 : vector<16x128xf32>
      %c0_41 = arith.constant 0 : index
      %c0_42 = arith.constant 0 : index
      %68 = vector.load %arg12[%c0_41, %c0_42] : memref<16x128xf32, #tpu.memory_space<vmem>>, vector<16x128xf32>
      tpu.vector_store %arg12[%c0_41, %c0_42], %67 {strides = array<i32>} : memref<16x128xf32, #tpu.memory_space<vmem>>, vector<16x128xf32>,
    } else {
    }
    %64 = arith.extui %60 : i1 to i32
    %c0_i32_39 = arith.constant 0 : i32
    %65 = arith.cmpi ne, %64, %c0_i32_39 : i32
    scf.if %65 {
      %c0_40 = arith.constant 0 : index
      %c0_41 = arith.constant 0 : index
      %66 = vector.load %arg12[%c0_40, %c0_41] : memref<16x128xf32, #tpu.memory_space<vmem>>, vector<16x128xf32>
      tpu.vector_store %arg12[%c0_40, %c0_41], %59 {strides = array<i32>} : memref<16x128xf32, #tpu.memory_space<vmem>>, vector<16x128xf32>,
    } else {
    }
    return
  }
  func.func @transform_0(%arg0: i32) -> (i32, i32) {
    %c0_i32 = arith.constant 0 : i32
    %c0_i32_0 = arith.constant 0 : i32
    %c0_i32_1 = arith.constant 0 : i32
    return %c0_i32, %c0_i32_0 : i32, i32
  }
  func.func @transform_1(%arg0: i32) -> (i32, i32) {
    %c0_i32 = arith.constant 0 : i32
    %c0_i32_0 = arith.constant 0 : i32
    %c0_i32_1 = arith.constant 0 : i32
    return %c0_i32, %c0_i32_0 : i32, i32
  }
  func.func @transform_2(%arg0: i32) -> (i32, i32) {
    %c0_i32 = arith.constant 0 : i32
    %c0_i32_0 = arith.constant 0 : i32
    %c0_i32_1 = arith.constant 0 : i32
    return %c0_i32, %c0_i32_0 : i32, i32
  }
  func.func @transform_3(%arg0: i32) -> (i32, i32) {
    %c0_i32 = arith.constant 0 : i32
    %c0_i32_0 = arith.constant 0 : i32
    %c0_i32_1 = arith.constant 0 : i32
    return %c0_i32, %c0_i32_0 : i32, i32
  }
  func.func @transform_4(%arg0: i32) -> (i32, i32, i32) {
    %c0_i32 = arith.constant 0 : i32
    %c0_i32_0 = arith.constant 0 : i32
    %c0_i32_1 = arith.constant 0 : i32
    return %arg0, %c0_i32, %c0_i32_0 : i32, i32, i32
  }
  func.func @transform_5(%arg0: i32) -> (i32, i32, i32) {
    %c0_i32 = arith.constant 0 : i32
    %c0_i32_0 = arith.constant 0 : i32
    %c0_i32_1 = arith.constant 0 : i32
    return %arg0, %c0_i32, %c0_i32_0 : i32, i32, i32
  }
  func.func @transform_6(%arg0: i32) -> (i32, i32, i32) {
    %c0_i32 = arith.constant 0 : i32
    %c0_i32_0 = arith.constant 0 : i32
    %c0_i32_1 = arith.constant 0 : i32
    return %arg0, %c0_i32, %c0_i32_0 : i32, i32, i32
  }
  func.func @transform_7(%arg0: i32) -> (i32, i32, i32) {
    %c0_i32 = arith.constant 0 : i32
    %c0_i32_0 = arith.constant 0 : i32
    %c0_i32_1 = arith.constant 0 : i32
    return %arg0, %c0_i32, %c0_i32_0 : i32, i32, i32
  }
  func.func @transform_8(%arg0: i32) -> (i32, i32, i32) {
    %c0_i32 = arith.constant 0 : i32
    %c0_i32_0 = arith.constant 0 : i32
    %c0_i32_1 = arith.constant 0 : i32
    return %arg0, %c0_i32, %c0_i32_0 : i32, i32, i32
  }
  func.func @transform_9(%arg0: i32) -> (i32, i32, i32) {
    %c0_i32 = arith.constant 0 : i32
    %c0_i32_0 = arith.constant 0 : i32
    %c0_i32_1 = arith.constant 0 : i32
    return %arg0, %c0_i32, %c0_i32_0 : i32, i32, i32
  }
  func.func @transform_10(%arg0: i32) -> (i32, i32, i32) {
    %c0_i32 = arith.constant 0 : i32
    %c0_i32_0 = arith.constant 0 : i32
    %c0_i32_1 = arith.constant 0 : i32
    return %arg0, %c0_i32, %c0_i32_0 : i32, i32, i32
  }
  func.func @transform_11(%arg0: i32) -> (i32, i32) {
    %c0_i32 = arith.constant 0 : i32
    %c0_i32_0 = arith.constant 0 : i32
    %c0_i32_1 = arith.constant 0 : i32
    return %c0_i32, %c0_i32_0 : i32, i32
  }
}

</mosaic_0001>

<bundles_post_ra>
// kernel: tpu_custom_call.1
= control target key start
LH: loop header
LB: loop body
LE: loop exit
PB: predicated region body
PF: predicated region fallthrough
CT: control target
= control target key end

     0   :  { %s1800_s0 = inlined_call_operand.vmem [shape: f32[16,128], index: 0, kind: input, shape index: {}]   ;;  %s1801_s1 = inlined_call_operand.hbm [shape: f32[16,16], index: 1, kind: input, shape index: {}]   ;;  %s1802_s2 = inlined_call_operand.hbm [shape: f32[16,16], index: 2, kind: input, shape index: {}]   ;;  %s1803_s3 = inlined_call_operand.vmem [shape: f32[16,1], index: 3, kind: input, shape index: {}]   ;;  %s1804_s4 = inlined_call_operand.hbm [shape: f32[2,16,128], index: 4, kind: input, shape index: {}]   ;;  %s1805_s5 = inlined_call_operand.hbm [shape: bf16[2,128,128], index: 5, kind: input, shape index: {}]   ;;  %s1806_s6 = inlined_call_operand.vmem [shape: f32[2,1,128], index: 6, kind: input, shape index: {}]   ;;  %s1807_s7 = inlined_call_operand.hbm [shape: bf16[2,128,128], index: 7, kind: input, shape index: {}]   ;;  %s1808_s8 = inlined_call_operand.vmem [shape: f32[2,1,128], index: 8, kind: input, shape index: {}]   ;;  %s1809_s9 = inlined_call_operand.vmem [shape: f32[2,1,128], index: 9, kind: input, shape index: {}]   ;;  %s1810_s10 = inlined_call_operand.vmem [shape: f32[2,1,128], index: 10, kind: input, shape index: {}]   ;;  %s1811_s11 = inlined_call_operand.hbm [shape: f32[16,128], index: 11, kind: output, shape index: {}]  }
   0x1   :  { %1823 = sst [smem:[#allocation18_spill]] %s1800_s0 }
   0x2   :  { %1824 = sst [smem:[#allocation19_spill]] %s1801_s1 }
   0x3   :  { %1825 = sst [smem:[#allocation20_spill]] %s1803_s3 }
   0x4   :  { %1826 = sst [smem:[#allocation21_spill]] %s1804_s4 }
   0x5   :  { %1827 = sst [smem:[#allocation22_spill]] %s1811_s11 }
   0x6   :  { %16 = vsyncpa [#allocation3], 0 }
   0x7   :  { %17 = vsyncpa [#allocation6], 0 }
   0x8   :  { %18 = vsyncpa [#allocation4], 0  ;;  %s1535_s17 = smov 0   ;;  %s1537_s18 = smov 0  }
   0x9   :  { %s1539_s19 = smov 0   ;;  %s1541_s20 = smov 0  }
   0xa LB: > { %1828 = sst [smem:[#allocation15_spill]] %s1459_s19  ;;  %s1554_s21 = sadd.s32 4294967295, %s1463_s20   ;;  %s1463_s20 = sphi %s1541_s20, %s1844_s20   ;;  %s1459_s19 = sphi %s1539_s19, %s1846_s19   ;;  %s1455_s18 = sphi %s1537_s18, %s1848_s18   ;;  %s1451_s17 = sphi %s1535_s17, %s1847_s17  }
   0xb   : > { %p128_p0 = scmp.ne.s32.totalorder %s1455_s18, %s1451_s17  ;;  %p129_p1 = scmp.eq.s32.totalorder %s1554_s21, 0 }
   0xc   : > { %p1035_p2 = scmp.ge.s32.totalorder %s1463_s20, 1  ;;  %p316_p3 = scmp.lt.s32.totalorder %s1463_s20, 3 }
   0xd   : > { %p1036_p4 = scmp.ne.s32.totalorder %s1554_s21, 0  ;;  %p1563_p5 = por %p129_p1, %p128_p0 }
   0xe   : > { %s1830_s1 = sld [smem:[#allocation19_spill]]  ;;  %p1570_p6 = pnand %p1035_p2, %p316_p3 }
   0xf   : > { %s1465_s27 = smov [#allocation2]   ;;  %s1583_s30 = sadd.s32 1, %s1463_s20  }
  0x10   : > { %p1166_p7 = pneg %p1570_p6  ;;  %s332_s28 = sshll.u32 %s1465_s27, 4  ;;  %s333_s28 = int_to_ptr.vmem [resolvable:$true] %s332_s28 }
  0x11   : > { %1833 = sst [smem:[#allocation16_spill]] %s1583_s30  ;;  %s1812_s12 = smov 128  }
  0x12   : > { %p1578_p8 = pnand %p1166_p7, %p129_p1  ;;  %s1814_s13 = smov 8  }
  0x13   : > { %s112_s14 = ssub.s32 %s1463_s20, %s1583_s30  ;;  %s115_s15 = sadd.s32 1, %s1459_s19 }
  0x14   : > { %s330_s25 = sshll.u32 %s1830_s1, 4  ;;  %p113_p9 = scmp.eq.s32.totalorder %s112_s14, 0  ;;  %s331_s25 = int_to_ptr.hbm [resolvable:$true] %s330_s25 }
  0x15   : > { %1169 = dma.hbm_to_vmem [thread:$0]  (!%p1578_p8), %s331_s25, 256, %s333_s28, [#allocation3], %s1812_s12, %s1812_s12, %s1814_s13  }
  0x16   : > { %p122_p10 = scmp.ne.s32.totalorder %s1459_s19, %s1455_s18  ;;  %p123_p11 = scmp.eq.s32.totalorder %s1463_s20, 0 }
  0x17   : > { %p1185_p12 = scmp.lt.s32.totalorder %s1463_s20, 2  ;;  %s363_s17 = sand.u32 1, %s1463_s20  }
  0x18   : > { %s1598_s16 = scalar_select %p113_p9, %s1459_s19, %s115_s15  }
  0x19   : > { %p124_p13 = por %p123_p11, %p122_p10  ;;  %s365_s23 = sand.u32 1, %s1459_s19  }
  0x1a   : > { %1834 = sst [smem:[#allocation17_spill]] %s1598_s16  ;;  %s1039_s24 = sshll.u32 %s365_s23, 4 }
  0x1b   : > { %s1129_s27 = sshll.u32 %s1463_s20, 4  ;;  %s1835_s4 = sld [smem:[#allocation21_spill]] }
  0x1c   : > { %s367_s12 = scalar_lea.vmem [#allocation7], %s1039_s24  ;;  %p1608_p0 = pnand %p1185_p12, %p124_p13 }
  0x1d   : > { %s375_s14 = sshll.u32 %s367_s12, 4  ;;  %s1612_s15 = sshll.u32 %s365_s23, 6  ;;  %s376_s14 = int_to_ptr.vmem [resolvable:$true] %s375_s14 }
  0x1e   : > { %s1821_s16 = sshll.u32 %s1463_s20, 6  ;;  %s1620_s11 = scalar_lea.sflag [#allocation3], %s363_s17 }
  0x1f   : > { %s394_s1 = scalar_lea.hbm %s1805_s5, %s1821_s16  ;;  %p1273_p3 = pneg %p1608_p0 }
  0x21   : > { %s372_s25 = scalar_lea.hbm %s1835_s4, %s1129_s27 }
  0x22   : > { %s373_s28 = sshll.u32 %s372_s25, 4  ;;  %s1276_s25 = scalar_lea.hbm %s1835_s4, 32  ;;  %s374_s28 = int_to_ptr.hbm [resolvable:$true] %s373_s28 }
  0x23   : > { %s1269_s12 = sshra.s32 %s374_s28, 4  ;;  %s1270_s12 = int_to_ptr.hbm [resolvable:$true] %s1269_s12 }
  0x24   : > { %s1271_s24 = scalar_lea.hbm %s1270_s12, 16  ;;  %p1277_p10 = scmp.lt.s32.totalorder %s1270_s12, %s1835_s4 }
  0x25   : > { %p1272_p2 = scmp.ne.s32.totalorder %s1270_s12, %s1271_s24  ;;  %p1278_p11 = scmp.lt.s32.totalorder %s1276_s25, %s1271_s24 }
  0x27   : > { %p1274_p7 = pnand %p1273_p3, %p1272_p2  ;;  %p1279_p12 = por %p1278_p11, %p1277_p10 }
  0x29   : > { %p1275_p9 = pneg %p1274_p7 }
  0x2b   : > { %p1280_p13 = pnand %p1279_p12, %p1275_p9 }
  0x2d   : > { %1283 = shalt.err (!%p1280_p13)
}
  0x2e   : > { %s1837_s19 = smov 8   ;;  %s1838_s30 = smov 128  }
  0x2f   : > { %1176 = dma.hbm_to_vmem [thread:$0]  (!%p1608_p0), %s374_s28, 256, %s376_s14, %s1620_s11, %s1838_s30, %s1838_s30, %s1837_s19  }
  0x30   : > { %s395_s17 = sshll.u32 %s394_s1, 4  ;;  %s389_s23 = scalar_lea.vmem [#allocation8], %s1612_s15  ;;  %s396_s17 = int_to_ptr.hbm [resolvable:$true] %s395_s17 }
  0x31   : > { %s397_s27 = sshll.u32 %s389_s23, 4  ;;  %s1299_s0 = sshra.s32 %s396_s17, 4  ;;  %s398_s27 = int_to_ptr.vmem [resolvable:$true] %s397_s27  ;;  %s1300_s0 = int_to_ptr.hbm [resolvable:$true] %s1299_s0 }
  0x32   : > { %s1301_s3 = scalar_lea.hbm %s1300_s0, 64  ;;  %s1306_s25 = scalar_lea.hbm %s1805_s5, 128 }
  0x33   : > { %p1302_p2 = scmp.ne.s32.totalorder %s1300_s0, %s1301_s3  ;;  %p1307_p10 = scmp.lt.s32.totalorder %s1300_s0, %s1805_s5 }
  0x34   : > { %p1308_p11 = scmp.lt.s32.totalorder %s1306_s25, %s1301_s3 }
  0x35   : > { %p1304_p7 = pnand %p1302_p2, %p1273_p3 }
  0x36   : > { %p1309_p12 = por %p1308_p11, %p1307_p10 }
  0x37   : > { %p1305_p9 = pneg %p1304_p7 }
  0x39   : > { %p1310_p13 = pnand %p1309_p12, %p1305_p9 }
  0x3b   : > { %1313 = shalt.err (!%p1310_p13)
}
  0x3c   : > { %s1822_s28 = smov 64   ;;  %s1469_s14 = smov 4  }
  0x3d   : > { %1179 = dma.hbm_to_vmem [thread:$0]  (!%p1608_p0), %s396_s17, 1024, %s398_s27, %s1620_s11, %s1822_s28, %s1822_s28, %s1469_s14  }
  0x3e   : > { %s344_s4 = sshll.u32 %s1802_s2, 4  ;;  %s1470_s16 = smov [#allocation5]   ;;  %s345_s4 = int_to_ptr.hbm [resolvable:$true] %s344_s4 }
  0x3f   : > { %s346_s0 = sshll.u32 %s1470_s16, 4  ;;  %s1839_s3 = sshll.u32 %s1463_s20, 6  ;;  %s347_s0 = int_to_ptr.vmem [resolvable:$true] %s346_s0 }
  0x40   : > { %1172 = dma.hbm_to_vmem [thread:$0]  (!%p1578_p8), %s345_s4, 256, %s347_s0, [#allocation6], %s1838_s30, %s1838_s30, %s1837_s19  }
  0x41   : > { %s422_s25 = scalar_lea.hbm %s1807_s7, %s1839_s3  ;;  %s417_s17 = scalar_lea.vmem [#allocation9], %s1612_s15 }
  0x42   : > { %s425_s27 = sshll.u32 %s417_s17, 4  ;;  %s423_s28 = sshll.u32 %s422_s25, 4  ;;  %s426_s27 = int_to_ptr.vmem [resolvable:$true] %s425_s27  ;;  %s424_s28 = int_to_ptr.hbm [resolvable:$true] %s423_s28 }
  0x43   : > { %s1359_s1 = sshra.s32 %s424_s28, 4  ;;  %s1366_s20 = scalar_lea.hbm %s1807_s7, 128  ;;  %s1360_s1 = int_to_ptr.hbm [resolvable:$true] %s1359_s1 }
  0x44   : > { %s1361_s23 = scalar_lea.hbm %s1360_s1, 64  ;;  %p1367_p8 = scmp.lt.s32.totalorder %s1360_s1, %s1807_s7 }
  0x45   : > { %p1362_p2 = scmp.ne.s32.totalorder %s1360_s1, %s1361_s23  ;;  %p1368_p10 = scmp.lt.s32.totalorder %s1366_s20, %s1361_s23 }
  0x47   : > { %p1364_p7 = pnand %p1362_p2, %p1273_p3  ;;  %p1369_p11 = por %p1368_p10, %p1367_p8 }
  0x49   : > { %p1365_p9 = pneg %p1364_p7 }
  0x4b   : > { %p1370_p12 = pnand %p1369_p11, %p1365_p9 }
  0x4d   : > { %1373 = shalt.err (!%p1370_p12)
}
  0x4e   : > { %s1840_s15 = smov 64   ;;  %455 = sbr.rel (%p1570_p6) target bundleno = 627 (0x273), region = 64 }
  0x4f   : > { %1182 = dma.hbm_to_vmem [thread:$0]  (!%p1608_p0), %s424_s28, 1024, %s426_s27, %s1620_s11, %s1840_s15, %s1840_s15, %s1469_s14  }
  0x53   : > { %1434 = dma.done.wait (%p129_p1), [#allocation3], 256  }
  0x54   : > { %1436 = vsyncadd (%p129_p1), [#allocation3], 4294967040 }
  0x55   : > { %1438 = dma.done.wait (%p129_p1), [#allocation6], 256  }
  0x56   : > { %1440 = vsyncadd (%p129_p1), [#allocation6], 4294967040  ;;  %s467_s13 = sand.u32 1, %s1554_s21   ;;  %s469_s11 = sand.u32 1, %s1455_s18  }
  0x57   : > { %s1051_s28 = sshll.u32 %s469_s11, 4  ;;  %s468_s26 = scalar_lea.sflag [#allocation3], %s467_s13 }
  0x58   : > { %s471_s14 = scalar_lea.vmem [#allocation7], %s1051_s28 }
  0x59   : > { %1442 = dma.done.wait (%p1563_p5), %s468_s26, 2304  }
  0x5a   : > { %1444 = vsyncadd (%p1563_p5), %s468_s26, 4294964992  ;;  %s1052_s16 = sshll.u32 %s469_s11, 6  ;;  %p548_p6 = scmp.lt.s32.totalorder %s1554_s21, 1 }
  0x5b   : > { %s1720_s30 = scalar_lea.vmem [#allocation8], %s1052_s16  ;;  %s1722_s4 = scalar_lea.vmem [#allocation9], %s1052_s16 }
  0x5c   : > { %s1702_s0 = scalar_select %p548_p6, %s1554_s21, 1 }
  0x5d   : > { %563 = sbr.rel (%p1036_p4) target bundleno = 102 (0x66), region = 88  ;;  %s1841_s11 = sld [smem:[#allocation18_spill]] (!%p1036_p4) }
  0x5e   : > { %s550_s24 = scalar_lea.vmem %s1806_s6, %s1702_s0  ;;  %s553_s27 = scalar_lea.vmem %s1808_s8, %s1702_s0 }
  0x5f   : > { %s556_s23 = scalar_lea.vmem %s1809_s9, %s1702_s0  ;;  %s559_s20 = scalar_lea.vmem %s1810_s10, %s1702_s0 }
  0x63   : > { %v564_v0 = vld [vmem:[%s1841_s11] sm:$0xff]  ;;  %v565_v1 = vld [vmem:[%s1841_s11 + $0x8] sm:$0xff] }
  0x64   : > { %566 = vst [vmem:[#allocation10] sm:$0xff] %v564_v0 }
  0x65   : > { %567 = vst [vmem:[#allocation10 + $0x8] sm:$0xff] %v565_v1 }
  0x66 PF: > { %v575_v2 = vld [vmem:[%s471_s14 + $0x8] sm:$0xff]  ;;  %v574_v4 = vld [vmem:[%s471_s14] sm:$0xff]  ;;  %vm576_vm0 = vcmask 130048   ;;  %s1842_s3 = sld [smem:[#allocation20_spill]]  ;;  %v1471_v34 = vmov 0   ;;  %p1123_p1 = scmp.eq.s32.totalorder %s1554_s21, 1 }
  0x67   : > { %597 = vmatpush.msra.mxu0 %v575_v2  ;;  %v572_v6 = vld [vmem:[#allocation5] sm:$0xff]  ;;  %v570_v7 = vld [vmem:[#allocation2] sm:$0xff]  ;;  %v1139_v8 = vld [vmem:[%s1720_s30 + $0x38] sm:$0xff]  ;;  %1232 = vset.pattern.permute.xlu0 %v1471_v34 }
  0x68   : > { %704 = vmatpush.bf16.msra.mxu2 %v1139_v8  ;;  %v1138_v9 = vld [vmem:[%s1720_s30 + $0x30] sm:$0xff]  ;;  %v573_v10 = vld [vmem:[#allocation5 + $0x8] sm:$0xff]  ;;  %v571_v11 = vld [vmem:[#allocation2 + $0x8] sm:$0xff] }
  0x69   : > { %598 = vmatpush.msra.mxu0 %v574_v4  ;;  %v1137_v12 = vld [vmem:[%s1720_s30 + $0x28] sm:$0xff]  ;;  %v1136_v13 = vld [vmem:[%s1720_s30 + $0x20] sm:$0xff]  ;;  %v1135_v14 = vld [vmem:[%s1720_s30 + $0x18] sm:$0xff] }
  0x6a   : > { %1055 = vmatmul.msk.f32.vlgmr.msra.gmra.mxu0 %vm576_vm0, %v572_v6  ;;  %v1134_v15 = vld [vmem:[%s1720_s30 + $0x10] sm:$0xff]  ;;  %v1133_v16 = vld [vmem:[%s1720_s30 + $0x8] sm:$0xff]  ;;  %v1132_v17 = vld [vmem:[%s1720_s30] sm:$0xff] }
  0x6b   : > { %v568_v5 = vld [vmem:[#allocation10] sm:$0xff]  ;;  %v1147_v18 = vld [vmem:[%s1722_s4 + $0x38] sm:$0xff]  ;;  %v1146_v19 = vld [vmem:[%s1722_s4 + $0x30] sm:$0xff] }
  0x6c   : > { %v569_v3 = vld [vmem:[#allocation10 + $0x8] sm:$0xff]  ;;  %705 = vmatpush.bf16.msra.mxu2 %v1138_v9  ;;  %789 = vmatpush.bf16.msra.mxu3 %v1147_v18  ;;  %v1144_v21 = vld [vmem:[%s1722_s4 + $0x20] sm:$0xff]  ;;  %v1143_v29 = vld [vmem:[%s1722_s4 + $0x18] sm:$0xff] }
  0x6d   : > { %626 = vmatpush.msra.mxu1 %v569_v3  ;;  %v1145_v20 = vld [vmem:[%s1722_s4 + $0x28] sm:$0xff]  ;;  %v1142_v30 = vld [vmem:[%s1722_s4 + $0x10] sm:$0xff]  ;;  %v1140_v32 = vld [vmem:[%s1722_s4] sm:$0xff] }
  0x6e   : > { %v1141_v31 = vld [vmem:[%s1722_s4 + $0x8] sm:$0xff]  ;;  %v803_v33 = vld [vmem:[%s1842_s3] sm:$0xff] }
  0x6f   : > { %627 = vmatpush.msra.mxu1 %v568_v5  ;;  %807 = vperm.xlu0 %1232, %v803_v33   ;;  %v804_v35 = vld [vmem:[%s1842_s3 + $0x8] sm:$0xff]  ;;  %v1233_v37 = vld [vmem:[%s550_s24] ss:$0 sm:$0xff] }
  0x70   : > { %1057 = vmatmul.msk.f32.vlgmr.msra.gmra.mxu1 %vm576_vm0, %v570_v7  ;;  %706 = vmatpush.bf16.msra.mxu2 %v1137_v12  ;;  %v1234_v46 = vld [vmem:[%s553_s27] ss:$0 sm:$0xff] }
  0x71   : > { %790 = vmatpush.bf16.msra.mxu3 %v1146_v19  ;;  %v1235_v18 = vld [vmem:[%s556_s23] ss:$0 sm:$0xff] }
  0x72   : > { %1056 = vmatmul.msk.f32.gmra.mxu0 %vm576_vm0, %v573_v10 }
  0x74   : > { %707 = vmatpush.bf16.msra.mxu2 %v1136_v13 }
  0x75   : > { %791 = vmatpush.bf16.msra.mxu3 %v1145_v20 }
  0x77   : > { %812 = vperm.xlu0 %1232, %v804_v35  }
  0x78   : > { %1058 = vmatmul.msk.f32.gmra.mxu1 %vm576_vm0, %v571_v11  ;;  %708 = vmatpush.bf16.msra.mxu2 %v1135_v14 }
  0x79   : > { %792 = vmatpush.bf16.msra.mxu3 %v1144_v21 }
  0x7c   : > { %709 = vmatpush.bf16.msra.mxu2 %v1134_v15 }
  0x7d   : > { %793 = vmatpush.bf16.msra.mxu3 %v1143_v29 }
  0x80   : > { %710 = vmatpush.bf16.msra.mxu2 %v1133_v16 }
  0x81   : > { %794 = vmatpush.bf16.msra.mxu3 %v1142_v30 }
  0x84   : > { %711 = vmatpush.bf16.msra.mxu2 %v1132_v17 }
  0x85   : > { %795 = vmatpush.bf16.msra.mxu3 %v1141_v31 }
  0x89   : > { %796 = vmatpush.bf16.msra.mxu3 %v1140_v32 }
  0xe1   : > { %v808_v44 = vpop.permute.xlu0 %807 }
  0xe7   : > { %v600_v22 = vpop.f32.mrf.mxu0 }
  0xe9   : > { %v813_v50 = vpop.permute.xlu0 %812 }
  0xed   : > { %v629_v23 = vpop.f32.mrf.mxu1 }
  0xee   : > { %v630_v26 = vadd.f32 %v629_v23, %v600_v22  ;;  %v1236_v22 = vld [vmem:[%s559_s20] ss:$0 sm:$0xff] }
  0xef   : > { %v603_v24 = vpop.f32.mrf.mxu0 }
  0xf5   : > { %v632_v25 = vpop.f32.mrf.mxu1 }
  0xf6   : > { %v633_v27 = vadd.f32 %v632_v25, %v603_v24 }
  0xf8   : > { %v635_v28 = vpack.c.bf16 %v633_v27, %v630_v26 }
  0xfa   : > { %712 = vmatmul.bf16.vlgmr.msra.gmra.mxu2 %v635_v28 }
 0x17d   : > { %v713_v36 = vpop.f32.mrf.mxu2 }
 0x17e   : > { %v714_v38 = vadd.f32 %v1233_v37, %v713_v36 }
 0x180   : > { %v718_v41 = vmax.f32 %v714_v38, 0.0 }
 0x185   : > { %v715_v39 = vpop.f32.mrf.mxu2 }
 0x186   : > { %v716_v40 = vadd.f32 %v1233_v37, %v715_v39 }
 0x188   : > { %v719_v42 = vmax.f32 %v716_v40, 0.0 }
 0x18a   : > { %v720_v43 = vpack.c.bf16 %v719_v42, %v718_v41 }
 0x18c   : > { %797 = vmatmul.bf16.vlgmr.msra.gmra.mxu3 %v720_v43 }
 0x20f   : > { %v798_v45 = vpop.f32.mrf.mxu3 }
 0x210   : > { %v799_v47 = vadd.f32 %v1234_v46, %v798_v45 }
 0x212   : > { %v815_v51 = vmul.f32 %v808_v44, %v799_v47 }
 0x217   : > { %v800_v48 = vpop.f32.mrf.mxu3 }
 0x218   : > { %v801_v49 = vadd.f32 %v1234_v46, %v800_v48 }
 0x21a   : > { %v816_v52 = vmul.f32 %v813_v50, %v801_v49 }
 0x21c   : > { %v817_v53 = vadd.f32 %v816_v52, %v815_v51 }
 0x21e   : > { %v818_v54 = vrot.slane %v817_v53, 4 }
 0x220   : > { %v819_v55 = vadd.f32 %v818_v54, %v817_v53 }
 0x222   : > { %v820_v56 = vrot.slane %v819_v55, 2 }
 0x224   : > { %v821_v57 = vadd.f32 %v820_v56, %v819_v55 }
 0x226   : > { %v822_v58 = vrot.slane %v821_v57, 1 }
 0x228   : > { %v823_v59 = vadd.f32 %v822_v58, %v821_v57 }
 0x22a   : > { %v824_v60 = vmul.f32 0.0625, %v823_v59 }
 0x22c   : > { %v825_v61 = vsub.f32 %v799_v47, %v824_v60  ;;  %v826_v62 = vsub.f32 %v801_v49, %v824_v60 }
 0x22e   : > { %v827_v63 = vmul.f32 %v825_v61, %v808_v44  ;;  %v828_v0 = vmul.f32 %v826_v62, %v813_v50 }
 0x230   : > { %v829_v1 = vmul.f32 %v827_v63, %v827_v63  ;;  %v830_v2 = vmul.f32 %v828_v0, %v828_v0 }
 0x232   : > { %v831_v3 = vadd.f32 %v830_v2, %v829_v1 }
 0x234   : > { %v832_v4 = vrot.slane %v831_v3, 4 }
 0x236   : > { %v833_v5 = vadd.f32 %v832_v4, %v831_v3 }
 0x238   : > { %v834_v6 = vrot.slane %v833_v5, 2 }
 0x23a   : > { %v835_v7 = vadd.f32 %v834_v6, %v833_v5 }
 0x23c   : > { %v836_v8 = vrot.slane %v835_v7, 1 }
 0x23e   : > { %v837_v9 = vadd.f32 %v836_v8, %v835_v7 }
 0x240   : > { %v838_v10 = vmul.f32 0.0625, %v837_v9 }
 0x242   : > { %v839_v11 = vadd.f32 1e-05, %v838_v10 }
 0x244   : > { %1237 = vrsqrt.f32 %v839_v11  ;;  %vm846_vm2 = vweird.f32 %v839_v11 }
 0x24a   : > { %v1238_v12 = vpop.eup %1237 }
 0x24b   : > { %v841_v13 = vmul.f32 %v1238_v12, %v839_v11  ;;  %vm847_vm1 = vweird.f32 %v1238_v12 }
 0x24c   : > { %vm848_vm3 = vmor %vm846_vm2, %vm847_vm1 }
 0x24d   : > { %v842_v14 = vmul.f32 %v1238_v12, %v841_v13 }
 0x24f   : > { %v843_v15 = vmul.f32 0.5, %v842_v14 }
 0x251   : > { %v844_v16 = vsub.f32 1.5, %v843_v15 }
 0x253   : > { %v845_v17 = vmul.f32 %v1238_v12, %v844_v16 }
 0x255   : > { %v849_v19 = vsel %vm848_vm3, %v1238_v12, %v845_v17 }
 0x256   : > { %v850_v20 = vmul.f32 %v849_v19, %v825_v61  ;;  %v851_v21 = vmul.f32 %v849_v19, %v826_v62  ;;  %868 = sbr.rel (%p1123_p1) target bundleno = 608 (0x260), region = 92 }
 0x258   : > { %v856_v23 = vmul.f32 %v1235_v18, %v850_v20  ;;  %v857_v24 = vmul.f32 %v1235_v18, %v851_v21 }
 0x25a   : > { %v862_v25 = vadd.f32 %v1236_v22, %v856_v23  ;;  %v863_v26 = vadd.f32 %v1236_v22, %v857_v24 }
 0x25c   : > { %v869_v27 = vmax.f32 %v862_v25, 0.0  ;;  %v870_v28 = vmax.f32 %v863_v26, 0.0 }
 0x25e   : > { %871 = vst [vmem:[#allocation10] sm:$0xff] %v869_v27 }
 0x25f   : > { %872 = vst [vmem:[#allocation10 + $0x8] sm:$0xff] %v870_v28 }
 0x260 PF: > { %p1124_p4 = scmp.ne.s32.totalorder %s1554_s21, 1 }
 0x262   : > { %875 = sbr.rel (%p1124_p4) target bundleno = 617 (0x269), region = 96 }
 0x267   : > { %876 = vst [vmem:[#allocation10] sm:$0xff] %v862_v25 }
 0x268   : > { %877 = vst [vmem:[#allocation10 + $0x8] sm:$0xff] %v863_v26 }
 0x269 PF: > { %s1843_s20 = sld [smem:[#allocation22_spill]]  ;;  %s1472_s15 = smov [#allocation10]  }
 0x26a   : > { %s883_s13 = sshll.u32 %s1472_s15, 4  ;;  %s1473_s28 = smov 128   ;;  %s884_s13 = int_to_ptr.vmem [resolvable:$true] %s883_s13 }
 0x26b   : > { %s1474_s26 = smov 8  }
 0x26f   : > { %s885_s4 = sshll.u32 %s1843_s20, 4  ;;  %s886_s4 = int_to_ptr.hbm [resolvable:$true] %s885_s4 }
 0x270   : > { %1163 = dma.vmem_to_hbm [thread:$0]  (%p1123_p1), %s884_s13, 256, %s886_s4, [#allocation4], %s1473_s28, %s1473_s28, %s1474_s26  }
 0x271   : > { %1446 = dma.done.wait (%p1123_p1), [#allocation4], 256  }
 0x272   : > { %1448 = vsyncadd (%p1123_p1), [#allocation4], 4294967040 }
 0x273 PF: > { %s1844_s20 = sld [smem:[#allocation16_spill]]  ;;  %s1847_s17 = smov %s1455_s18 }
 0x274   : > { %s1845_s14 = sld [smem:[#allocation15_spill]] }
 0x275   : > { %s1846_s19 = sld [smem:[#allocation17_spill]] }
 0x279   : > { %p21_p5 = scmp.ge.s32.totalorder %s1844_s20, 4  }
 0x27a   : > { %s1848_s18 = smov %s1845_s14 }
 0x27b   :  { %23 = sbr.rel (!%p21_p5) target bundleno = 10 (0xa), region = 154 }
 0x280   :  { %902 = vsyncpa [#allocation3], 1 }
 0x281   :  { %904 = vsyncpa [#allocation3 + $0x1], 1 }
 0x282   :  { %905 = vsyncpa [#allocation6], 1 }
 0x283   :  { %906 = vsyncpa [#allocation4], 1 }
 0x284   :  { %908 = vsyncpa [#allocation4 + $0x1], 1 }

</bundles_post_ra>
